<compile_context>
chip_gen: v6e
topology: v6e:2x2x1
jax: 0.10.0
libtpu: 0.0.40
codegen_flags: <defaults>
</compile_context>

<pallas_src>
import functools

import numpy as np
import jax
import jax.numpy as jnp
from jax.experimental import pallas as pl
from jax.experimental.pallas import tpu as pltpu

LN_EPS = 1e-5  # torch.nn.LayerNorm default


# ----------------------------- small helpers -------------------------------

def _round_up(n, m):
    return ((n + m - 1) // m) * m


def _pick_row_tile(rows, dtype, max_tile):
    """Largest row tile <= max_tile, multiple of 8 (16 for bf16 activations)."""
    sub = 16 if jnp.dtype(dtype) == jnp.dtype(jnp.bfloat16) else 8
    return min(max_tile, _round_up(rows, sub))


def _pick_h_block(H, target=1024):
    """Hidden-dim block: a multiple of 128 that divides H exactly (<= target), so no
    masking is ever needed on the contraction axis; falls back to the full H."""
    if H <= target or H % 128 != 0:
        return H
    best, t = 128, 128
    while t <= target:
        if H % t == 0:
            best = t
        t += 128
    return best


def _vmem_budget(needed_bytes):
    """Generation-aware VMEM limit: 1.5x the estimated working set, clamped to
    ~85% of the device's physical per-core VMEM (128 MiB v5e/v6e, 64 MiB v7x)."""
    try:
        cap = int(pltpu.get_tpu_info().vmem_capacity_bytes)
    except Exception:
        cap = 128 * 1024 * 1024
    hi = int(cap * 0.85)
    return int(min(max(needed_bytes * 3 // 2, 16 * 1024 * 1024), hi))


def _invariant_spec(block_shape, index_map):
    """BlockSpec for grid-invariant operands: single-buffered (double-buffering a
    constant-index block buys no overlap, only VMEM)."""
    try:
        return pl.BlockSpec(block_shape, index_map, pipeline_mode=pl.Buffered(1))
    except Exception:  # older jax without pipeline_mode — default buffering
        return pl.BlockSpec(block_shape, index_map)


# ----------------------------- Pallas kernels -----------------------------

def _layernorm_kernel(x_ref, gb_ref, o_ref, *, eps):
    """Row-tiled LayerNorm over the last (lane) axis.  x:(T, D), gb:(2, D)."""
    x = x_ref[...].astype(jnp.float32)
    mu = jnp.mean(x, axis=-1, keepdims=True)
    xc = x - mu
    var = jnp.mean(xc * xc, axis=-1, keepdims=True)
    y = xc * jax.lax.rsqrt(var + eps)                       # rsqrt -> EUP slot
    gb = gb_ref[...]
    o_ref[...] = (y * gb[0:1, :] + gb[1:2, :]).astype(o_ref.dtype)


def _sandwich_ffn_kernel(x_ref, vec_ref, w1_ref, b1_ref, w2_ref,
                         o_ref, h_scr, acc_scr, *, eps):
    """Fused SandwichNorm with a FeedForward fn, hidden dim blocked on grid axis 1:
         k == 0    : pre-LN(x) -> h_scr (bf16), zero acc
         every k   : acc += gelu(h @ W1[:, k] + b1[k]) @ W2[k, :]   (bf16 MXU, f32 acc)
         k == last : post-LN(acc + b2) -> o_ref
    """
    k = pl.program_id(1)

    @pl.when(k == 0)
    def _():
        x = x_ref[...].astype(jnp.float32)                  # (T, D)
        vec = vec_ref[...]                                  # (5, D) f32
        mu = jnp.mean(x, axis=-1, keepdims=True)
        xc = x - mu
        var = jnp.mean(xc * xc, axis=-1, keepdims=True)
        h = xc * jax.lax.rsqrt(var + eps)
        h = h * vec[0:1, :] + vec[1:2, :]                   # pre gamma / beta
        h_scr[...] = h.astype(h_scr.dtype)                  # bf16 operand for the MXU
        acc_scr[...] = jnp.zeros_like(acc_scr)

    # --- FeedForward over this hidden block: bf16 MXU operands, f32 accumulation ---
    h1 = jnp.dot(h_scr[...], w1_ref[...],
                 preferred_element_type=jnp.float32) + b1_ref[...]
    h1 = jax.nn.gelu(h1, approximate=True)                  # tanh -> EUP slot
    acc_scr[...] += jnp.dot(h1.astype(w2_ref.dtype), w2_ref[...],
                            preferred_element_type=jnp.float32)

    @pl.when(k == pl.num_programs(1) - 1)
    def _():
        vec = vec_ref[...]
        h2 = acc_scr[...] + vec[4:5, :]                     # + b2
        mu2 = jnp.mean(h2, axis=-1, keepdims=True)
        hc = h2 - mu2
        var2 = jnp.mean(hc * hc, axis=-1, keepdims=True)
        y = hc * jax.lax.rsqrt(var2 + eps)
        o_ref[...] = (y * vec[2:3, :] + vec[3:4, :]).astype(o_ref.dtype)  # post LN


# ----------------------------- wrappers ------------------------------------

def layernorm(x, gamma, beta, *, eps=LN_EPS, max_tile=1024):
    """Pallas LayerNorm over the last axis of x (any leading shape)."""
    D = x.shape[-1]
    orig_shape = x.shape
    x2 = x.reshape(-1, D)
    R = x2.shape[0]
    tile = _pick_row_tile(R, x.dtype, max_tile)
    gb = jnp.stack([gamma, beta]).astype(jnp.float32)       # (2, D)

    itemsize = jnp.dtype(x.dtype).itemsize
    needed = 4 * tile * D * itemsize + tile * D * 4 + 8 * D * 4

    out = pl.pallas_call(
        functools.partial(_layernorm_kernel, eps=eps),
        out_shape=jax.ShapeDtypeStruct((R, D), x.dtype),
        grid=(pl.cdiv(R, tile),),
        in_specs=[
            pl.BlockSpec((tile, D), lambda i: (i, 0)),
            _invariant_spec((2, D), lambda i: (0, 0)),
        ],
        out_specs=pl.BlockSpec((tile, D), lambda i: (i, 0)),
        compiler_params=pltpu.CompilerParams(
            dimension_semantics=("parallel",),
            vmem_limit_bytes=_vmem_budget(needed)),
    )(x2, gb)
    return out.reshape(orig_shape)


def sandwich_norm_ffn(params, x, *, eps=LN_EPS, max_tile=512, max_h_block=1024):
    """Fused fast path: SandwichNorm whose fn is the built-in FeedForward.
    One HBM round trip of the activations per row tile."""
    D = x.shape[-1]
    H = params["w1"].shape[1]
    orig_shape = x.shape
    x2 = x.reshape(-1, D)
    R = x2.shape[0]
    tile = _pick_row_tile(R, x.dtype, max_tile)
    tH = _pick_h_block(H, max_h_block)
    n_h = H // tH
    n_i = pl.cdiv(R, tile)

    # Consolidate the six per-feature vectors into two operands (fewer DMA streams).
    vecs = jnp.stack([params["pre_gamma"], params["pre_beta"],
                      params["post_gamma"], params["post_beta"],
                      params["b2"]]).astype(jnp.float32)    # (5, D)
    b1 = params["b1"].reshape(1, H).astype(jnp.float32)     # (1, H)
    w1 = params["w1"].astype(jnp.bfloat16)                  # (D, H) bf16 MXU operand
    w2 = params["w2"].astype(jnp.bfloat16)                  # (H, D)

    itemsize = jnp.dtype(x.dtype).itemsize
    needed = (2 * tile * D * itemsize            # x blocks (double-buffered)
              + 2 * tile * D * itemsize          # out blocks
              + 2 * (D * tH + tH * D) * 2        # W1/W2 blocks (bf16, double-buffered)
              + 2 * 8 * tH * 4                   # b1 blocks (sublane-padded)
              + 8 * D * 4                        # stacked vectors (single-buffered)
              + tile * D * (4 + 2)               # acc (f32) + h (bf16) scratch
              + tile * tH * 4)                   # h1 intermediate

    cost = pl.CostEstimate(
        flops=4 * R * D * H,                                # two matmuls
        transcendentals=R * H,                              # tanh in GELU
        bytes_accessed=(2 * R * D * itemsize                # x in, out
                        + n_i * 2 * D * H * 2               # weights streamed per row tile
                        + (5 * D + H) * 4))

    out = pl.pallas_call(
        functools.partial(_sandwich_ffn_kernel, eps=eps),
        out_shape=jax.ShapeDtypeStruct((R, D), x.dtype),
        grid=(n_i, n_h),
        in_specs=[
            pl.BlockSpec((tile, D), lambda i, k: (i, 0)),   # x tile (resident across k)
            _invariant_spec((5, D), lambda i, k: (0, 0)),   # gammas / betas / b2
            pl.BlockSpec((D, tH), lambda i, k: (0, k)),     # W1 hidden block
            pl.BlockSpec((1, tH), lambda i, k: (0, k)),     # b1 hidden block
            pl.BlockSpec((tH, D), lambda i, k: (k, 0)),     # W2 hidden block
        ],
        out_specs=pl.BlockSpec((tile, D), lambda i, k: (i, 0)),
        scratch_shapes=[pltpu.VMEM((tile, D), jnp.bfloat16),   # pre-normed activations
                        pltpu.VMEM((tile, D), jnp.float32)],   # FFN output accumulator
        compiler_params=pltpu.CompilerParams(
            dimension_semantics=("parallel", "arbitrary"),
            vmem_limit_bytes=_vmem_budget(needed)),
        cost_estimate=cost,
    )(x2, vecs, w1, b1, w2)
    return out.reshape(orig_shape)


def sandwich_norm_forward(params, x, fn, **kwargs):
    """Faithful SandwichNorm.forward for an ARBITRARY JAX callable `fn`:
       Pallas pre-LN  ->  fn(x, **kwargs)  ->  Pallas post-LN."""
    x = layernorm(x, params["pre_gamma"], params["pre_beta"])
    x = fn(x, **kwargs)
    x = layernorm(x, params["post_gamma"], params["post_beta"])
    return x


# ----------------------------- params & reference --------------------------

def init_params(key, dim, hidden):
    ks = jax.random.split(key, 6)
    return {
        "pre_gamma": 1.0 + 0.1 * jax.random.normal(ks[0], (dim,), jnp.float32),
        "pre_beta": 0.1 * jax.random.normal(ks[1], (dim,), jnp.float32),
        "post_gamma": 1.0 + 0.1 * jax.random.normal(ks[2], (dim,), jnp.float32),
        "post_beta": 0.1 * jax.random.normal(ks[3], (dim,), jnp.float32),
        "w1": jax.random.normal(ks[4], (dim, hidden), jnp.float32) * 0.1,
        "b1": jnp.zeros((hidden,), jnp.float32),
        "w2": jax.random.normal(ks[5], (hidden, dim), jnp.float32) * 0.1,
        "b2": jnp.zeros((dim,), jnp.float32),
    }


def _layernorm_ref(x, g, b, eps=LN_EPS):
    mu = jnp.mean(x, axis=-1, keepdims=True)
    var = jnp.mean((x - mu) ** 2, axis=-1, keepdims=True)
    return (x - mu) * jax.lax.rsqrt(var + eps) * g + b


def _ffn_ref(params, x):
    # NOTE: tanh-approx GELU; PyTorch nn.GELU defaults to exact erf (~1e-3 difference).
    h = jax.nn.gelu(x @ params["w1"] + params["b1"], approximate=True)
    return h @ params["w2"] + params["b2"]


def _sandwich_ref(params, x):
    h = _layernorm_ref(x, params["pre_gamma"], params["pre_beta"])
    h = _ffn_ref(params, h)
    return _layernorm_ref(h, params["post_gamma"], params["post_beta"])


# ----------------------------- demo / self-test ----------------------------

if __name__ == "__main__":
    # Small but lane-aligned shapes (D, H multiples of 128) per the perf guidance.
    batch, seq, dim, hidden = 2, 8, 128, 256

    key = jax.random.PRNGKey(0)
    kp, kx = jax.random.split(key)
    params = init_params(kp, dim, hidden)
    x = jax.random.normal(kx, (batch, seq, dim), jnp.float32)

    # Fast path: fully fused sandwich (pre-LN -> FFN -> post-LN) in one Pallas kernel.
    out_fused = jax.block_until_ready(sandwich_norm_ffn(params, x))
    assert out_fused.shape == (batch, seq, dim), out_fused.shape

    # Generic path: Pallas LayerNorm kernels around an arbitrary fn.
    out_generic = jax.block_until_ready(
        sandwich_norm_forward(params, x, lambda t: _ffn_ref(params, t)))

    # Pure-jnp reference of the module forward (f32 throughout).
    want = _sandwich_ref(params, x)
    # Fused path uses bf16 MXU operands (f32 accumulation) -> looser tolerance.
    np.testing.assert_allclose(np.asarray(out_fused), np.asarray(want),
                               rtol=5e-2, atol=5e-2)
    # Generic path is all-f32.
    np.testing.assert_allclose(np.asarray(out_generic), np.asarray(want),
                               rtol=1e-4, atol=1e-4)

    print("KERNEL_OK")
</pallas_src>

<mosaic_0001>
module attributes {stable_mosaic.version = 11 : i64} {
  func.func @_sandwich_ffn_kernel(%arg0: i32, %arg1: i32, %arg2: memref<16x128xf32, #tpu.memory_space<vmem>>, %arg3: memref<5x128xf32, #tpu.memory_space<vmem>>, %arg4: memref<128x256xbf16, #tpu.memory_space<vmem>>, %arg5: memref<1x256xf32, #tpu.memory_space<vmem>>, %arg6: memref<256x128xbf16, #tpu.memory_space<vmem>>, %arg7: memref<16x128xf32, #tpu.memory_space<vmem>>, %arg8: memref<16x128xbf16, #tpu.memory_space<vmem>>, %arg9: memref<16x128xf32, #tpu.memory_space<vmem>>) attributes {dimension_semantics = [#tpu.dimension_semantics<parallel>, #tpu.dimension_semantics<arbitrary>], iteration_bounds = array<i64: 1, 1>, scalar_prefetch = 0 : i64, scratch_operands = 2 : i64, tpu.core_type = #tpu.core_type<tc>, window_params = [{transform_indices = @transform_0, window_bounds = array<i64: 16, 128>}, {pipeline_mode = #tpu.pipeline_mode<synchronous>, transform_indices = @transform_1, window_bounds = array<i64: 5, 128>}, {transform_indices = @transform_2, window_bounds = array<i64: 128, 256>}, {transform_indices = @transform_3, window_bounds = array<i64: 1, 256>}, {transform_indices = @transform_4, window_bounds = array<i64: 256, 128>}, {transform_indices = @transform_5, window_bounds = array<i64: 16, 128>}]} {
    %c0_i32 = arith.constant 0 : i32
    %0 = arith.cmpi eq, %arg1, %c0_i32 : i32
    %1 = arith.extui %0 : i1 to i32
    %c0_i32_0 = arith.constant 0 : i32
    %2 = arith.cmpi ne, %1, %c0_i32_0 : i32
    scf.if %2 {
      %c0_19 = arith.constant 0 : index
      %c0_20 = arith.constant 0 : index
      %31 = vector.load %arg2[%c0_19, %c0_20] : memref<16x128xf32, #tpu.memory_space<vmem>>, vector<16x128xf32>
      %c0_21 = arith.constant 0 : index
      %c0_22 = arith.constant 0 : index
      %32 = vector.load %arg3[%c0_21, %c0_22] : memref<5x128xf32, #tpu.memory_space<vmem>>, vector<5x128xf32>
      %cst_23 = arith.constant dense<0.000000e+00> : vector<16xf32>
      %33 = vector.multi_reduction <add>, %31, %cst_23 [1] : vector<16x128xf32> to vector<16xf32>
      %34 = vector.shape_cast %33 : vector<16xf32> to vector<16x1xf32>
      %cst_24 = arith.constant 1.280000e+02 : f32
      %35 = vector.broadcast %cst_24 : f32 to vector<16x1xf32>
      %36 = arith.divf %34, %35 : vector<16x1xf32>
      %37 = vector.broadcast %36 : vector<16x1xf32> to vector<16x128xf32>
      %38 = arith.subf %31, %37 : vector<16x128xf32>
      %39 = arith.mulf %38, %38 : vector<16x128xf32>
      %cst_25 = arith.constant dense<0.000000e+00> : vector<16xf32>
      %40 = vector.multi_reduction <add>, %39, %cst_25 [1] : vector<16x128xf32> to vector<16xf32>
      %41 = vector.shape_cast %40 : vector<16xf32> to vector<16x1xf32>
      %cst_26 = arith.constant 1.280000e+02 : f32
      %42 = vector.broadcast %cst_26 : f32 to vector<16x1xf32>
      %43 = arith.divf %41, %42 : vector<16x1xf32>
      %cst_27 = arith.constant 9.99999974E-6 : f32
      %44 = vector.broadcast %cst_27 : f32 to vector<16x1xf32>
      %45 = arith.addf %43, %44 : vector<16x1xf32>
      %46 = math.rsqrt %45 : vector<16x1xf32>
      %47 = vector.broadcast %46 : vector<16x1xf32> to vector<16x128xf32>
      %48 = arith.mulf %38, %47 : vector<16x128xf32>
      %49 = vector.extract_strided_slice %32 {offsets = [0, 0], sizes = [1, 128], strides = [1, 1]} : vector<5x128xf32> to vector<1x128xf32>
      %50 = vector.broadcast %49 : vector<1x128xf32> to vector<16x128xf32>
      %51 = arith.mulf %48, %50 : vector<16x128xf32>
      %52 = vector.extract_strided_slice %32 {offsets = [1, 0], sizes = [1, 128], strides = [1, 1]} : vector<5x128xf32> to vector<1x128xf32>
      %53 = vector.broadcast %52 : vector<1x128xf32> to vector<16x128xf32>
      %54 = arith.addf %51, %53 : vector<16x128xf32>
      %55 = arith.truncf %54 : vector<16x128xf32> to vector<16x128xbf16>
      %c0_28 = arith.constant 0 : index
      %c0_29 = arith.constant 0 : index
      %56 = vector.load %arg8[%c0_28, %c0_29] : memref<16x128xbf16, #tpu.memory_space<vmem>>, vector<16x128xbf16>
      tpu.vector_store %arg8[%c0_28, %c0_29], %55 {strides = array<i32>} : memref<16x128xbf16, #tpu.memory_space<vmem>>, vector<16x128xbf16>,
      %cst_30 = arith.constant 0.000000e+00 : f32
      %57 = vector.broadcast %cst_30 : f32 to vector<16x128xf32>
      %c0_31 = arith.constant 0 : index
      %c0_32 = arith.constant 0 : index
      %58 = vector.load %arg9[%c0_31, %c0_32] : memref<16x128xf32, #tpu.memory_space<vmem>>, vector<16x128xf32>
      tpu.vector_store %arg9[%c0_31, %c0_32], %57 {strides = array<i32>} : memref<16x128xf32, #tpu.memory_space<vmem>>, vector<16x128xf32>,
    } else {
    }
    %c0 = arith.constant 0 : index
    %c0_1 = arith.constant 0 : index
    %3 = vector.load %arg8[%c0, %c0_1] : memref<16x128xbf16, #tpu.memory_space<vmem>>, vector<16x128xbf16>
    %c0_2 = arith.constant 0 : index
    %c0_3 = arith.constant 0 : index
    %4 = vector.load %arg4[%c0_2, %c0_3] : memref<128x256xbf16, #tpu.memory_space<vmem>>, vector<128x256xbf16>
    %cst = arith.constant dense<0.000000e+00> : vector<16x256xf32>
    %5 = tpu.matmul %3, %4, %cst {dimension_numbers = #tpu.dot_dimension_numbers<[1], [0], [0], [1], [0, 0, 1, 1], [], []>} : vector<16x128xbf16>, vector<128x256xbf16>, vector<16x256xf32> -> vector<16x256xf32>
    %c0_4 = arith.constant 0 : index
    %c0_5 = arith.constant 0 : index
    %6 = vector.load %arg5[%c0_4, %c0_5] : memref<1x256xf32, #tpu.memory_space<vmem>>, vector<1x256xf32>
    %7 = vector.broadcast %6 : vector<1x256xf32> to vector<16x256xf32>
    %8 = arith.addf %5, %7 : vector<16x256xf32>
    %9 = arith.mulf %8, %8 : vector<16x256xf32>
    %10 = arith.mulf %8, %9 : vector<16x256xf32>
    %cst_6 = arith.constant 4.471500e-02 : f32
    %11 = vector.broadcast %cst_6 : f32 to vector<16x256xf32>
    %12 = arith.mulf %11, %10 : vector<16x256xf32>
    %13 = arith.addf %8, %12 : vector<16x256xf32>
    %cst_7 = arith.constant 0.797884583 : f32
    %14 = vector.broadcast %cst_7 : f32 to vector<16x256xf32>
    %15 = arith.mulf %14, %13 : vector<16x256xf32>
    %16 = math.tanh %15 : vector<16x256xf32>
    %cst_8 = arith.constant 1.000000e+00 : f32
    %17 = vector.broadcast %cst_8 : f32 to vector<16x256xf32>
    %18 = arith.addf %17, %16 : vector<16x256xf32>
    %cst_9 = arith.constant 5.000000e-01 : f32
    %19 = vector.broadcast %cst_9 : f32 to vector<16x256xf32>
    %20 = arith.mulf %19, %18 : vector<16x256xf32>
    %21 = arith.mulf %8, %20 : vector<16x256xf32>
    %c0_10 = arith.constant 0 : index
    %c0_11 = arith.constant 0 : index
    %22 = vector.load %arg9[%c0_10, %c0_11] : memref<16x128xf32, #tpu.memory_space<vmem>>, vector<16x128xf32>
    %23 = arith.truncf %21 : vector<16x256xf32> to vector<16x256xbf16>
    %c0_12 = arith.constant 0 : index
    %c0_13 = arith.constant 0 : index
    %24 = vector.load %arg6[%c0_12, %c0_13] : memref<256x128xbf16, #tpu.memory_space<vmem>>, vector<256x128xbf16>
    %cst_14 = arith.constant dense<0.000000e+00> : vector<16x128xf32>
    %25 = tpu.matmul %23, %24, %cst_14 {dimension_numbers = #tpu.dot_dimension_numbers<[1], [0], [0], [1], [0, 0, 1, 1], [], []>} : vector<16x256xbf16>, vector<256x128xbf16>, vector<16x128xf32> -> vector<16x128xf32>
    %26 = arith.addf %22, %25 : vector<16x128xf32>
    %c0_15 = arith.constant 0 : index
    %c0_16 = arith.constant 0 : index
    %27 = vector.load %arg9[%c0_15, %c0_16] : memref<16x128xf32, #tpu.memory_space<vmem>>, vector<16x128xf32>
    tpu.vector_store %arg9[%c0_15, %c0_16], %26 {strides = array<i32>} : memref<16x128xf32, #tpu.memory_space<vmem>>, vector<16x128xf32>,
    %c0_i32_17 = arith.constant 0 : i32
    %28 = arith.cmpi eq, %arg1, %c0_i32_17 : i32
    %29 = arith.extui %28 : i1 to i32
    %c0_i32_18 = arith.constant 0 : i32
    %30 = arith.cmpi ne, %29, %c0_i32_18 : i32
    scf.if %30 {
      %c0_19 = arith.constant 0 : index
      %c0_20 = arith.constant 0 : index
      %31 = vector.load %arg3[%c0_19, %c0_20] : memref<5x128xf32, #tpu.memory_space<vmem>>, vector<5x128xf32>
      %c0_21 = arith.constant 0 : index
      %c0_22 = arith.constant 0 : index
      %32 = vector.load %arg9[%c0_21, %c0_22] : memref<16x128xf32, #tpu.memory_space<vmem>>, vector<16x128xf32>
      %33 = vector.extract_strided_slice %31 {offsets = [4, 0], sizes = [1, 128], strides = [1, 1]} : vector<5x128xf32> to vector<1x128xf32>
      %34 = vector.broadcast %33 : vector<1x128xf32> to vector<16x128xf32>
      %35 = arith.addf %32, %34 : vector<16x128xf32>
      %cst_23 = arith.constant dense<0.000000e+00> : vector<16xf32>
      %36 = vector.multi_reduction <add>, %35, %cst_23 [1] : vector<16x128xf32> to vector<16xf32>
      %37 = vector.shape_cast %36 : vector<16xf32> to vector<16x1xf32>
      %cst_24 = arith.constant 1.280000e+02 : f32
      %38 = vector.broadcast %cst_24 : f32 to vector<16x1xf32>
      %39 = arith.divf %37, %38 : vector<16x1xf32>
      %40 = vector.broadcast %39 : vector<16x1xf32> to vector<16x128xf32>
      %41 = arith.subf %35, %40 : vector<16x128xf32>
      %42 = arith.mulf %41, %41 : vector<16x128xf32>
      %cst_25 = arith.constant dense<0.000000e+00> : vector<16xf32>
      %43 = vector.multi_reduction <add>, %42, %cst_25 [1] : vector<16x128xf32> to vector<16xf32>
      %44 = vector.shape_cast %43 : vector<16xf32> to vector<16x1xf32>
      %cst_26 = arith.constant 1.280000e+02 : f32
      %45 = vector.broadcast %cst_26 : f32 to vector<16x1xf32>
      %46 = arith.divf %44, %45 : vector<16x1xf32>
      %cst_27 = arith.constant 9.99999974E-6 : f32
      %47 = vector.broadcast %cst_27 : f32 to vector<16x1xf32>
      %48 = arith.addf %46, %47 : vector<16x1xf32>
      %49 = math.rsqrt %48 : vector<16x1xf32>
      %50 = vector.broadcast %49 : vector<16x1xf32> to vector<16x128xf32>
      %51 = arith.mulf %41, %50 : vector<16x128xf32>
      %52 = vector.extract_strided_slice %31 {offsets = [2, 0], sizes = [1, 128], strides = [1, 1]} : vector<5x128xf32> to vector<1x128xf32>
      %53 = vector.broadcast %52 : vector<1x128xf32> to vector<16x128xf32>
      %54 = arith.mulf %51, %53 : vector<16x128xf32>
      %55 = vector.extract_strided_slice %31 {offsets = [3, 0], sizes = [1, 128], strides = [1, 1]} : vector<5x128xf32> to vector<1x128xf32>
      %56 = vector.broadcast %55 : vector<1x128xf32> to vector<16x128xf32>
      %57 = arith.addf %54, %56 : vector<16x128xf32>
      %c0_28 = arith.constant 0 : index
      %c0_29 = arith.constant 0 : index
      %58 = vector.load %arg7[%c0_28, %c0_29] : memref<16x128xf32, #tpu.memory_space<vmem>>, vector<16x128xf32>
      tpu.vector_store %arg7[%c0_28, %c0_29], %57 {strides = array<i32>} : memref<16x128xf32, #tpu.memory_space<vmem>>, vector<16x128xf32>,
    } else {
    }
    return
  }
  func.func @transform_0(%arg0: i32, %arg1: i32) -> (i32, i32) {
    %c0_i32 = arith.constant 0 : i32
    %c0_i32_0 = arith.constant 0 : i32
    return %arg0, %c0_i32 : i32, i32
  }
  func.func @transform_1(%arg0: i32, %arg1: i32) -> (i32, i32) {
    %c0_i32 = arith.constant 0 : i32
    %c0_i32_0 = arith.constant 0 : i32
    %c0_i32_1 = arith.constant 0 : i32
    return %c0_i32, %c0_i32_0 : i32, i32
  }
  func.func @transform_2(%arg0: i32, %arg1: i32) -> (i32, i32) {
    %c0_i32 = arith.constant 0 : i32
    %c0_i32_0 = arith.constant 0 : i32
    return %c0_i32, %arg1 : i32, i32
  }
  func.func @transform_3(%arg0: i32, %arg1: i32) -> (i32, i32) {
    %c0_i32 = arith.constant 0 : i32
    %c0_i32_0 = arith.constant 0 : i32
    return %c0_i32, %arg1 : i32, i32
  }
  func.func @transform_4(%arg0: i32, %arg1: i32) -> (i32, i32) {
    %c0_i32 = arith.constant 0 : i32
    %c0_i32_0 = arith.constant 0 : i32
    return %arg1, %c0_i32 : i32, i32
  }
  func.func @transform_5(%arg0: i32, %arg1: i32) -> (i32, i32) {
    %c0_i32 = arith.constant 0 : i32
    %c0_i32_0 = arith.constant 0 : i32
    return %arg0, %c0_i32 : i32, i32
  }
}

</mosaic_0001>

<bundles_post_ra>
// kernel: tpu_custom_call.1
= control target key start
LH: loop header
LB: loop body
LE: loop exit
PB: predicated region body
PF: predicated region fallthrough
CT: control target
= control target key end

     0   :  { %10 = vsyncpa [#allocation5], 0  ;;  %s882_s0 = inlined_call_operand.hbm [shape: f32[16,128], index: 0, kind: input, shape index: {}]   ;;  %s883_s1 = inlined_call_operand.hbm [shape: f32[5,128], index: 1, kind: input, shape index: {}]   ;;  %s884_s2 = inlined_call_operand.hbm [shape: bf16[128,256], index: 2, kind: input, shape index: {}]   ;;  %s885_s3 = inlined_call_operand.vmem [shape: f32[1,256], index: 3, kind: input, shape index: {}]   ;;  %s886_s4 = inlined_call_operand.hbm [shape: bf16[256,128], index: 4, kind: input, shape index: {}]   ;;  %s887_s5 = inlined_call_operand.hbm [shape: f32[16,128], index: 5, kind: output, shape index: {}]  }
   0x1   :  { %11 = vsyncpa [#allocation8], 0 }
   0x2   :  { %12 = vsyncpa [#allocation11], 0 }
   0x3   :  { %13 = vsyncpa [#allocation6], 0  ;;  %s808_s18 = smov [#allocation7]   ;;  %s809_s20 = smov [#allocation4]  }
   0x4   :  { %s32_s19 = sshll.u32 %s808_s18, 4  ;;  %s19_s21 = sshll.u32 %s809_s20, 4  ;;  %s33_s19 = int_to_ptr.vmem [resolvable:$true] %s32_s19  ;;  %s20_s21 = int_to_ptr.vmem [resolvable:$true] %s19_s21 }
   0x5   :  { %s708_s22 = scalar_lea.vmem %s33_s19, 128  ;;  %p713_p1 = scmp.lt.s32.totalorder %s33_s19, %s33_s19 }
   0x6   :  { %p709_p0 = scmp.ne.s32.totalorder %s33_s19, %s708_s22  ;;  %p714_p2 = scmp.lt.s32.totalorder %s708_s22, %s708_s22 }
   0x8   :  { %p715_p3 = por %p714_p2, %p713_p1 }
   0xa   :  { %p716_p4 = pnand %p715_p3, %p709_p0 }
   0xc   :  { %719 = shalt.err (!%p716_p4)
}
   0xd   :  { %35 = dma.hbm_to_vmem [thread:$0]  %s883_s1, 128, %s33_s19, [#allocation8]  }
   0xe   :  { %s728_s25 = scalar_lea.vmem %s20_s21, 256  ;;  %p733_p6 = scmp.lt.s32.totalorder %s20_s21, %s20_s21 }
   0xf   :  { %p729_p5 = scmp.ne.s32.totalorder %s20_s21, %s728_s25  ;;  %p734_p7 = scmp.lt.s32.totalorder %s728_s25, %s728_s25 }
  0x11   :  { %p735_p8 = por %p734_p7, %p733_p6 }
  0x13   :  { %p736_p9 = pnand %p735_p8, %p729_p5 }
  0x15   :  { %739 = shalt.err (!%p736_p9)
}
  0x16   :  { %s810_s26 = smov 128   ;;  %s811_s27 = smov 8  }
  0x17   :  { %25 = dma.hbm_to_vmem [thread:$0]  %s882_s0, 256, %s20_s21, [#allocation5], %s810_s26, %s810_s26, %s811_s27  }
  0x18   :  { %s812_s30 = smov [#allocation9]   ;;  %s813_s7 = smov [#allocation10]  }
  0x19   :  { %s41_s6 = sshll.u32 %s812_s30, 4  ;;  %s55_s1 = sshll.u32 %s813_s7, 4  ;;  %s42_s6 = int_to_ptr.vmem [resolvable:$true] %s41_s6  ;;  %s56_s1 = int_to_ptr.vmem [resolvable:$true] %s55_s1 }
  0x1a   :  { %s748_s8 = scalar_lea.vmem %s42_s6, 2048  ;;  %p753_p11 = scmp.lt.s32.totalorder %s42_s6, %s42_s6 }
  0x1b   :  { %p749_p10 = scmp.ne.s32.totalorder %s42_s6, %s748_s8  ;;  %p754_p12 = scmp.lt.s32.totalorder %s748_s8, %s748_s8 }
  0x1d   :  { %p755_p13 = por %p754_p12, %p753_p11 }
  0x1f   :  { %p756_p0 = pnand %p755_p13, %p749_p10 }
  0x21   :  { %759 = shalt.err (!%p756_p0)
}
  0x22   :  { %47 = dma.hbm_to_vmem [thread:$0]  %s884_s2, 2048, %s42_s6, [#allocation8], %s810_s26, %s810_s26, %s811_s27  }
  0x23   :  { %s768_s0 = scalar_lea.vmem %s56_s1, 2048  ;;  %p773_p2 = scmp.lt.s32.totalorder %s56_s1, %s56_s1 }
  0x24   :  { %p769_p1 = scmp.ne.s32.totalorder %s56_s1, %s768_s0  ;;  %p774_p3 = scmp.lt.s32.totalorder %s768_s0, %s768_s0 }
  0x26   :  { %p775_p4 = por %p774_p3, %p773_p2 }
  0x28   :  { %p776_p5 = pnand %p775_p4, %p769_p1 }
  0x2a   :  { %779 = shalt.err (!%p776_p5)
}
  0x2b   :  { %s814_s11 = smov 64   ;;  %s815_s12 = smov 4  }
  0x2c   :  { %61 = dma.hbm_to_vmem [thread:$0]  %s886_s4, 2048, %s56_s1, [#allocation11], %s814_s11, %s814_s11, %s815_s12  }
  0x2d   :  { %800 = dma.done.wait [#allocation5], 256  }
  0x2e   :  { %801 = vsyncadd [#allocation5], 4294967040 }
  0x2f   :  { %802 = dma.done.wait [#allocation8], 2176  }
  0x30   :  { %803 = vsyncadd [#allocation8], 4294965120 }
  0x31   :  { %804 = dma.done.wait [#allocation11], 2048  }
  0x32   :  { %805 = vsyncadd [#allocation11], 4294965248  ;;  %v79_v0 = vld [vmem:[#allocation4] sm:$0xff]  ;;  %v80_v1 = vld [vmem:[#allocation4 + $0x8] sm:$0xff]  ;;  %v816_v26 = vmov 0   ;;  %v105_v32 = vlaneseq }
  0x33   :  { %82 = vadd.xlane.f32.xlu0 %v79_v0  ;;  %v643_v10 = vld [vmem:[#allocation9 + $0x74] ss:$8 sps:$4 sm:$0xff]   ;;  %v645_v11 = vld [vmem:[#allocation9 + $0x70] ss:$8 sps:$4 sm:$0xff]   ;;  %v646_v12 = vld [vmem:[#allocation9 + $0x64] ss:$8 sps:$4 sm:$0xff]   ;;  %277 = vmatprep.mubr.bf16.mxu0 %v816_v26 }
  0x34   :  { %245 = vmatprep.subr.bf16.mxu0 %v643_v10  ;;  %v648_v13 = vld [vmem:[#allocation9 + $0x60] ss:$8 sps:$4 sm:$0xff]   ;;  %v649_v14 = vld [vmem:[#allocation9 + $0x54] ss:$8 sps:$4 sm:$0xff]   ;;  %v651_v15 = vld [vmem:[#allocation9 + $0x50] ss:$8 sps:$4 sm:$0xff]  }
  0x35   :  { %246 = vmatpush1.bf16.msra.mxu0 %v645_v11  ;;  %v652_v16 = vld [vmem:[#allocation9 + $0x44] ss:$8 sps:$4 sm:$0xff]   ;;  %v654_v17 = vld [vmem:[#allocation9 + $0x40] ss:$8 sps:$4 sm:$0xff]   ;;  %v655_v18 = vld [vmem:[#allocation9 + $0x34] ss:$8 sps:$4 sm:$0xff]  }
  0x36   :  { %247 = vmatprep.subr.bf16.mxu0 %v646_v12  ;;  %v657_v19 = vld [vmem:[#allocation9 + $0x30] ss:$8 sps:$4 sm:$0xff]   ;;  %v658_v20 = vld [vmem:[#allocation9 + $0x24] ss:$8 sps:$4 sm:$0xff]   ;;  %v660_v21 = vld [vmem:[#allocation9 + $0x20] ss:$8 sps:$4 sm:$0xff]  }
  0x37   :  { %84 = vadd.xlane.f32.xlu0 %v80_v1  ;;  %v661_v22 = vld [vmem:[#allocation9 + $0x14] ss:$8 sps:$4 sm:$0xff]   ;;  %v663_v23 = vld [vmem:[#allocation9 + $0x10] ss:$8 sps:$4 sm:$0xff]   ;;  %v664_v24 = vld [vmem:[#allocation9 + $0x4] ss:$8 sps:$4 sm:$0xff]  }
  0x38   :  { %v666_v25 = vld [vmem:[#allocation9] ss:$8 sps:$4 sm:$0xff]   ;;  %v866_v34 = vshrl.u32 %v105_v32, 7  ;;  %v81_v36 = vld [vmem:[#allocation7] sm:$0x1f]  ;;  %v670_v52 = vld [vmem:[#allocation10 + $0x70] sm:$0xff]  }
  0x39   :  { %248 = vmatpush1.bf16.msra.mxu0 %v648_v13  ;;  %v668_v50 = vld [vmem:[#allocation10 + $0x78] sm:$0xff]   ;;  %v671_v53 = vld [vmem:[#allocation10 + $0x30] sm:$0xff]   ;;  %v672_v54 = vld [vmem:[#allocation10 + $0x68] sm:$0xff]  }
  0x3a   :  { %249 = vmatprep.subr.bf16.mxu0 %v649_v14  ;;  %v107_v35 = vsub.s32 0, %v866_v34  ;;  %v113_v39 = vsub.s32 1, %v866_v34  ;;  %v669_v51 = vld [vmem:[#allocation10 + $0x38] sm:$0xff]   ;;  %611 = vmatprep.subr.bf16.mxu1 %v668_v50  ;;  %v673_v55 = vld [vmem:[#allocation10 + $0x28] sm:$0xff]   ;;  %v674_v56 = vld [vmem:[#allocation10 + $0x60] sm:$0xff]  }
  0x3b   :  { %612 = vmatpush3.bf16.msra.mxu1 %v669_v51  ;;  %v675_v57 = vld [vmem:[#allocation10 + $0x20] sm:$0xff]   ;;  %v676_v58 = vld [vmem:[#allocation10 + $0x58] sm:$0xff]   ;;  %v678_v60 = vld [vmem:[#allocation10 + $0x50] sm:$0xff]  }
  0x3c   :  { %v108_v38 = vrot.slane %v81_v36, %v107_v35  ;;  %v114_v42 = vrot.slane %v81_v36, %v113_v39  ;;  %613 = vmatprep.subr.bf16.mxu1 %v670_v52  ;;  %v677_v59 = vld [vmem:[#allocation10 + $0x18] sm:$0xff]   ;;  %v679_v61 = vld [vmem:[#allocation10 + $0x10] sm:$0xff]   ;;  %v680_v62 = vld [vmem:[#allocation10 + $0x48] sm:$0xff]   ;;  %v509_v52 = vsub.s32 4, %v866_v34 }
  0x3d   :  { %250 = vmatpush1.bf16.msra.mxu0 %v651_v15  ;;  %v681_v63 = vld [vmem:[#allocation10 + $0x8] sm:$0xff]  }
  0x3e   :  { %251 = vmatprep.subr.bf16.mxu0 %v652_v16 }
  0x3f   :  { %614 = vmatpush3.bf16.msra.mxu1 %v671_v53  ;;  %v504_v53 = vld [vmem:[#allocation7] sm:$0x1f] }
  0x40   :  { %615 = vmatprep.subr.bf16.mxu1 %v672_v54 }
  0x41   :  { %252 = vmatpush1.bf16.msra.mxu0 %v654_v17 }
  0x42   :  { %253 = vmatprep.subr.bf16.mxu0 %v655_v18 }
  0x43   :  { %616 = vmatpush3.bf16.msra.mxu1 %v673_v55  ;;  %v510_v55 = vrot.slane %v504_v53, %v509_v52 }
  0x44   :  { %617 = vmatprep.subr.bf16.mxu1 %v674_v56 }
  0x45   :  { %254 = vmatpush1.bf16.msra.mxu0 %v657_v19 }
  0x46   :  { %255 = vmatprep.subr.bf16.mxu0 %v658_v20 }
  0x47   :  { %618 = vmatpush3.bf16.msra.mxu1 %v675_v57 }
  0x48   :  { %619 = vmatprep.subr.bf16.mxu1 %v676_v58 }
  0x49   :  { %256 = vmatpush1.bf16.msra.mxu0 %v660_v21 }
  0x4a   :  { %257 = vmatprep.subr.bf16.mxu0 %v661_v22 }
  0x4b   :  { %620 = vmatpush3.bf16.msra.mxu1 %v677_v59 }
  0x4c   :  { %621 = vmatprep.subr.bf16.mxu1 %v678_v60 }
  0x4d   :  { %258 = vmatpush1.bf16.msra.mxu0 %v663_v23 }
  0x4e   :  { %259 = vmatprep.subr.bf16.mxu0 %v664_v24 }
  0x4f   :  { %622 = vmatpush3.bf16.msra.mxu1 %v679_v61 }
  0x50   :  { %623 = vmatprep.subr.bf16.mxu1 %v680_v62 }
  0x51   :  { %260 = vmatpush1.bf16.msra.mxu0 %v666_v25 }
  0x53   :  { %624 = vmatpush3.bf16.msra.mxu1 %v681_v63 }
  0xbc   :  { %v83_v2 = vpop.xlane.xlu0 %82 }
  0xbd   :  { %v87_v3 = vmul.f32 0.0078125, %v83_v2  ;;  %v147_v2 = vld [vmem:[%s885_s3] sm:$0x3]  ;;  %s817_s3 = smov [#allocation12]  }
  0xbe   :  { %s555_s15 = sshll.u32 %s817_s3, 4  ;;  %s556_s15 = int_to_ptr.vmem [resolvable:$true] %s555_s15 }
  0xbf   :  { %v89_v4 = vsub.f32 %v79_v0, %v87_v3  ;;  %v682_v0 = vld [vmem:[#allocation10 + $0x40] sm:$0xff]   ;;  %v152_v3 = vrot.slane %v147_v2, %v107_v35  ;;  %s780_s16 = scalar_lea.vmem %s556_s15, 256  ;;  %p785_p7 = scmp.lt.s32.totalorder %s556_s15, %s556_s15 }
  0xc0   :  { %v85_v5 = vpop.xlane.xlu0 %84  ;;  %625 = vmatprep.subr.bf16.mxu1 %v682_v0  ;;  %p781_p6 = scmp.ne.s32.totalorder %s556_s15, %s780_s16  ;;  %p786_p8 = scmp.lt.s32.totalorder %s780_s16, %s780_s16 }
  0xc1   :  { %v88_v6 = vmul.f32 0.0078125, %v85_v5  ;;  %v91_v7 = vmul.f32 %v89_v4, %v89_v4 }
  0xc2   :  { %p787_p9 = por %p786_p8, %p785_p7 }
  0xc3   :  { %v90_v8 = vsub.f32 %v80_v1, %v88_v6  ;;  %93 = vadd.xlane.f32.xlu1 %v91_v7  ;;  %v683_v1 = vld [vmem:[#allocation10] sm:$0xff]  }
  0xc4   :  { %626 = vmatpush3.bf16.msra.mxu1 %v683_v1  ;;  %p788_p10 = pnand %p787_p9, %p781_p6 }
  0xc5   :  { %v92_v9 = vmul.f32 %v90_v8, %v90_v8 }
  0xc7   :  { %95 = vadd.xlane.f32.xlu1 %v92_v9 }
 0x14c   :  { %v94_v27 = vpop.xlane.xlu1 %93 }
 0x14d   :  { %v97_v28 = vmul.f32 0.0078125, %v94_v27 }
 0x14f   :  { %v99_v29 = vadd.f32 1e-05, %v97_v28 }
 0x150   :  { %v96_v30 = vpop.xlane.xlu1 %95 }
 0x151   :  { %684 = vrsqrt.f32 %v99_v29  ;;  %v98_v31 = vmul.f32 0.0078125, %v96_v30 }
 0x153   :  { %v100_v33 = vadd.f32 1e-05, %v98_v31 }
 0x155   :  { %686 = vrsqrt.f32 %v100_v33 }
 0x15e   :  { %v685_v37 = vpop.eup %684 }
 0x15f   :  { %v103_v40 = vmul.f32 %v685_v37, %v89_v4  ;;  %v156_v4 = vrot.slane %v147_v2, %v113_v39 }
 0x161   :  { %v109_v43 = vmul.f32 %v108_v38, %v103_v40 }
 0x162   :  { %v687_v41 = vpop.eup %686 }
 0x163   :  { %v104_v44 = vmul.f32 %v687_v41, %v90_v8  ;;  %v115_v46 = vadd.f32 %v114_v42, %v109_v43 }
 0x165   :  { %v110_v45 = vmul.f32 %v108_v38, %v104_v44 }
 0x167   :  { %v116_v47 = vadd.f32 %v114_v42, %v110_v45 }
 0x169   :  { %v609_v48 = vpack.c.bf16 %v116_v47, %v115_v46 }
 0x16b   :  { %610 = vst [vmem:[#allocation2] sm:$0xff] %v609_v48  }
 0x172   :  { %v667_v49 = vld [vmem:[#allocation2] sm:$0xff]  }
 0x173   :  { %278 = vmatmul.mubr.bf16.vlgmr.msra.gmra.mxu0 %v667_v49 }
 0x233   :  { %v279_v5 = vpop.f32.mrf.mxu0 }
 0x234   :  { %v280_v6 = vadd.f32 %v279_v5, %v152_v3 }
 0x235   :  { %v281_v7 = vpop.f32.mrf.mxu0 }
 0x236   :  { %v288_v8 = vmul.f32 %v280_v6, %v280_v6  ;;  %v282_v9 = vadd.f32 %v281_v7, %v156_v4 }
 0x237   :  { %v283_v10 = vpop.f32.mrf.mxu0 }
 0x238   :  { %v292_v11 = vmul.f32 %v288_v8, %v280_v6  ;;  %v289_v12 = vmul.f32 %v282_v9, %v282_v9  ;;  %v284_v13 = vadd.f32 %v283_v10, %v152_v3 }
 0x239   :  { %v285_v14 = vpop.f32.mrf.mxu0 }
 0x23a   :  { %v296_v15 = vmul.f32 0.044715, %v292_v11  ;;  %v293_v16 = vmul.f32 %v289_v12, %v282_v9  ;;  %v290_v17 = vmul.f32 %v284_v13, %v284_v13  ;;  %v286_v18 = vadd.f32 %v285_v14, %v156_v4 }
 0x23b   :  { %v544_v14 = vsub.s32 3, %v866_v34 }
 0x23c   :  { %v300_v19 = vadd.f32 %v296_v15, %v280_v6  ;;  %v297_v20 = vmul.f32 0.044715, %v293_v16  ;;  %v294_v21 = vmul.f32 %v290_v17, %v284_v13  ;;  %v291_v22 = vmul.f32 %v286_v18, %v286_v18 }
 0x23e   :  { %v304_v23 = vmul.f32 0.7978846, %v300_v19  ;;  %v301_v24 = vadd.f32 %v297_v20, %v282_v9  ;;  %v298_v25 = vmul.f32 0.044715, %v294_v21  ;;  %v295_v26 = vmul.f32 %v291_v22, %v286_v18 }
 0x240   :  { %v302_v27 = vadd.f32 %v298_v25, %v284_v13  ;;  %v299_v28 = vmul.f32 0.044715, %v295_v26  ;;  %v305_v29 = vmul.f32 0.7978846, %v301_v24  ;;  %688 = vtanh.f32 %v304_v23 }
 0x242   :  { %v306_v30 = vmul.f32 0.7978846, %v302_v27  ;;  %v303_v31 = vadd.f32 %v299_v28, %v286_v18  ;;  %690 = vtanh.f32 %v305_v29 }
 0x244   :  { %692 = vtanh.f32 %v306_v30  ;;  %v307_v32 = vmul.f32 0.7978846, %v303_v31 }
 0x246   :  { %694 = vtanh.f32 %v307_v32 }
 0x24d   :  { %v689_v33 = vpop.eup %688 }
 0x24e   :  { %v312_v38 = vadd.f32 1.0, %v689_v33 }
 0x24f   :  { %v691_v35 = vpop.eup %690 }
 0x250   :  { %v313_v36 = vadd.f32 1.0, %v691_v35  ;;  %v316_v44 = vmul.f32 0.5, %v312_v38 }
 0x251   :  { %v693_v37 = vpop.eup %692 }
 0x252   :  { %v314_v39 = vadd.f32 1.0, %v693_v37  ;;  %v317_v42 = vmul.f32 0.5, %v313_v36  ;;  %v320_v49 = vmul.f32 %v316_v44, %v280_v6 }
 0x253   :  { %v695_v40 = vpop.eup %694 }
 0x254   :  { %v315_v41 = vadd.f32 1.0, %v695_v40  ;;  %v318_v43 = vmul.f32 0.5, %v314_v39  ;;  %v321_v47 = vmul.f32 %v317_v42, %v282_v9 }
 0x256   :  { %v319_v45 = vmul.f32 0.5, %v315_v41  ;;  %v322_v46 = vmul.f32 %v318_v43, %v284_v13  ;;  %v538_v13 = vsub.s32 2, %v866_v34 }
 0x258   :  { %v323_v48 = vmul.f32 %v319_v45, %v286_v18  ;;  %v326_v51 = vpack.c.bf16 %v322_v46, %v320_v49  ;;  %v539_v15 = vrot.slane %v504_v53, %v538_v13  ;;  %v545_v18 = vrot.slane %v504_v53, %v544_v14 }
 0x25a   :  { %v327_v50 = vpack.c.bf16 %v323_v48, %v321_v47 }
 0x25c   :  { %488 = vmatprep.mubr.bf16.mxu1 %v327_v50 }
 0x25d   :  { %489 = vmatmul.mubr.bf16.vlgmr.msra.gmra.mxu1 %v326_v51 }
 0x31d   :  { %v627_v54 = vpop.f32.mrf.mxu1 }
 0x31f   :  { %v628_v56 = vpop.f32.mrf.mxu1 }
 0x320   :  { %v629_v57 = vadd.f32 %v628_v56, %v627_v54 }
 0x321   :  { %v630_v58 = vpop.f32.mrf.mxu1 }
 0x322   :  { %v511_v59 = vadd.f32 %v629_v57, %v510_v55 }
 0x323   :  { %v631_v60 = vpop.f32.mrf.mxu1 }
 0x324   :  { %v632_v61 = vadd.f32 %v631_v60, %v630_v58  ;;  %513 = vadd.xlane.f32.xlu0 %v511_v59 }
 0x326   :  { %v512_v62 = vadd.f32 %v632_v61, %v510_v55 }
 0x328   :  { %515 = vadd.xlane.f32.xlu1 %v512_v62 }
 0x3ad   :  { %v514_v63 = vpop.xlane.xlu0 %513 }
 0x3ae   :  { %v518_v0 = vmul.f32 0.0078125, %v514_v63 }
 0x3b0   :  { %v520_v1 = vsub.f32 %v511_v59, %v518_v0 }
 0x3b1   :  { %v516_v2 = vpop.xlane.xlu1 %515 }
 0x3b2   :  { %v519_v3 = vmul.f32 0.0078125, %v516_v2  ;;  %v522_v4 = vmul.f32 %v520_v1, %v520_v1 }
 0x3b4   :  { %v521_v5 = vsub.f32 %v512_v62, %v519_v3  ;;  %524 = vadd.xlane.f32.xlu0 %v522_v4 }
 0x3b6   :  { %v523_v6 = vmul.f32 %v521_v5, %v521_v5 }
 0x3b8   :  { %526 = vadd.xlane.f32.xlu1 %v523_v6 }
 0x43d   :  { %v525_v7 = vpop.xlane.xlu0 %524 }
 0x43e   :  { %v528_v8 = vmul.f32 0.0078125, %v525_v7 }
 0x440   :  { %v530_v9 = vadd.f32 1e-05, %v528_v8 }
 0x441   :  { %v527_v10 = vpop.xlane.xlu1 %526 }
 0x442   :  { %696 = vrsqrt.f32 %v530_v9  ;;  %v529_v11 = vmul.f32 0.0078125, %v527_v10 }
 0x444   :  { %v531_v12 = vadd.f32 1e-05, %v529_v11 }
 0x446   :  { %698 = vrsqrt.f32 %v531_v12 }
 0x44f   :  { %v697_v16 = vpop.eup %696 }
 0x450   :  { %v534_v17 = vmul.f32 %v697_v16, %v520_v1 }
 0x452   :  { %v540_v19 = vmul.f32 %v539_v15, %v534_v17 }
 0x453   :  { %v699_v20 = vpop.eup %698 }
 0x454   :  { %v535_v21 = vmul.f32 %v699_v20, %v521_v5  ;;  %v546_v22 = vadd.f32 %v545_v18, %v540_v19 }
 0x456   :  { %v541_v23 = vmul.f32 %v539_v15, %v535_v21  ;;  %548 = vst [vmem:[#allocation12] sm:$0xff] %v546_v22 }
 0x458   :  { %v547_v24 = vadd.f32 %v545_v18, %v541_v23 }
 0x45a   :  { %549 = vst [vmem:[#allocation12 + $0x8] sm:$0xff] %v547_v24 }
 0x45b   :  { %791 = shalt.err (!%p788_p10)
}
 0x45c   :  { %561 = dma.vmem_to_hbm [thread:$0]  %s556_s15, 256, %s887_s5, [#allocation6], %s810_s26, %s810_s26, %s811_s27  }
 0x45d   :  { %806 = dma.done.wait [#allocation6], 256  }
 0x45e   :  { %807 = vsyncadd [#allocation6], 4294967040 }
 0x45f   :  { %565 = vsyncpa [#allocation5], 1 }
 0x460   :  { %566 = vsyncpa [#allocation8], 1 }
 0x461   :  { %567 = vsyncpa [#allocation11], 1 }
 0x462   :  { %568 = vsyncpa [#allocation6], 1 }

</bundles_post_ra>
